<compile_context>
chip_gen: v5e
topology: v5e:2x2
jax: 0.10.0
libtpu: 0.0.40
codegen_flags: <defaults>
</compile_context>

<pallas_src>
import numpy as np
import jax
import jax.numpy as jnp
from jax import lax
from jax.experimental import pallas as pl
from jax.experimental.pallas import tpu as pltpu


def _round_up(x: int, m: int) -> int:
    return (x + m - 1) // m * m


def _pad2d(a, rows, cols):
    r, c = a.shape
    return jnp.pad(a, ((0, rows - r), (0, cols - c)))


# ---------------------------------------------------------------------------
# Fused kernel: multi-hot embedding-x-W1 matmul + Linear/ReLU x2 + head.
# Everything for one batch tile is resident in VMEM; all matmuls on the MXU
# with f32 accumulation.
# ---------------------------------------------------------------------------
def _fused_mlp_kernel(xn_ref, idx_ref, w1n_ref, t_ref, b1_ref,
                      w2_ref, b2_ref, wh_ref, bh_ref, o_ref):
    tb = xn_ref.shape[0]
    n_cat = idx_ref.shape[1]
    total_cat = t_ref.shape[0]
    out_dim = o_ref.shape[1]

    # ---- layer 1, numeric slice of w1 ----
    h = jnp.dot(xn_ref[...], w1n_ref[...], preferred_element_type=jnp.float32)

    # ---- layer 1, categorical slice: single multi-hot matmul against the
    #      offline-fused table T = emb @ w1e (per-feature block-diagonal) ----
    idx = idx_ref[...]                                          # (tb, n_cat)
    iota = lax.broadcasted_iota(jnp.int32, (tb, total_cat), 1)  # hoisted once
    mhot = (idx[:, 0:1] == iota).astype(t_ref.dtype)
    for j in range(1, n_cat):                                   # static, tiny
        mhot = mhot + (idx[:, j:j + 1] == iota).astype(t_ref.dtype)
    h = h + jnp.dot(mhot, t_ref[...], preferred_element_type=jnp.float32)

    h = jnp.maximum(h + b1_ref[...], 0.0)                       # bias+ReLU f32

    # ---- layer 2 ----
    h = jnp.dot(h.astype(w2_ref.dtype), w2_ref[...],
                preferred_element_type=jnp.float32)
    h = jnp.maximum(h + b2_ref[...], 0.0)

    # ---- head: lane-padded MXU matmul, narrow (TB, out_dim) store ----
    acc = jnp.dot(h.astype(wh_ref.dtype), wh_ref[...],
                  preferred_element_type=jnp.float32) + bh_ref[...]
    o_ref[...] = acc[:, :out_dim]


def _choose_tile(B: int):
    """Pick (TB, n_steps): small waste, even step count for v7x's 2 TCs."""
    B_pad = _round_up(B, 16)
    if B_pad <= 256:
        return B_pad, 1
    n_steps = max(2, pl.cdiv(B_pad, 512))
    if n_steps % 2:
        n_steps += 1                       # balanced across 2 TensorCores
    tb = _round_up(pl.cdiv(B_pad, n_steps), 16)
    n_steps = pl.cdiv(B_pad, tb)
    return tb, n_steps


def fused_mlp_forward(xn, idx, kp, out_dim):
    """xn: (B, n_num) bf16, idx: (B, n_cat) int32 (already offset-adjusted)."""
    B, n_num = xn.shape
    n_cat = idx.shape[1]
    total_cat, H1 = kp["t"].shape
    H2 = kp["w2"].shape[1]
    OUTP = kp["wh"].shape[1]

    # One-hot categorical path only sensible for modest vocabularies.
    assert total_cat <= 2048, "use a gather-based path for large vocabularies"

    TB, n_steps = _choose_tile(B)
    B_full = TB * n_steps
    if B_full != B:
        xn = jnp.pad(xn, ((0, B_full - B), (0, 0)))
        idx = jnp.pad(idx, ((0, B_full - B), (0, 0)))

    def resident(shape):
        return pl.BlockSpec(shape, lambda i: (0, 0))   # weights stay in VMEM

    out = pl.pallas_call(
        _fused_mlp_kernel,
        out_shape=jax.ShapeDtypeStruct((B_full, out_dim), jnp.float32),
        grid=(n_steps,),
        in_specs=[
            pl.BlockSpec((TB, n_num), lambda i: (i, 0)),   # numeric features
            pl.BlockSpec((TB, n_cat), lambda i: (i, 0)),   # category indices
            resident((n_num, H1)),                         # w1 (numeric part)
            resident((total_cat, H1)),                     # fused emb @ w1e
            resident((1, H1)),                             # b1
            resident((H1, H2)),                            # w2
            resident((1, H2)),                             # b2
            resident((H2, OUTP)),                          # head weight
            resident((1, OUTP)),                           # head bias
        ],
        out_specs=pl.BlockSpec((TB, out_dim), lambda i: (i, 0)),
        compiler_params=pltpu.CompilerParams(
            dimension_semantics=("parallel",)),
    )(xn, idx, kp["w1n"], kp["t"], kp["b1"],
      kp["w2"], kp["b2"], kp["wh"], kp["bh"])

    return out[:B, :]


def model_forward(inputs_n, inputs_c, kp, out_dim):
    """Full Model.forward: encoder(MLP) + head, eval mode."""
    idx = inputs_c.astype(jnp.int32) + kp["offsets"][None, :]
    xn = inputs_n.astype(jnp.bfloat16)
    return fused_mlp_forward(xn, idx, kp, out_dim)


# ---------------------------------------------------------------------------
# Parameters: logical (PyTorch-shaped, f32) init + kernel-layout preparation
# (split w1, fuse emb @ w1e, zero-pad to lane-dense widths, cast to bf16).
# ---------------------------------------------------------------------------
def init_params(key, n_num, categories, d_embedding, d_layers, out_dim):
    ks = jax.random.split(key, 4)
    n_cat = len(categories)
    d_in = n_num + n_cat * d_embedding
    h1, h2 = d_layers

    def lin(k, fan_in, fan_out):
        bound = 1.0 / np.sqrt(fan_in)
        kw, kb = jax.random.split(k)
        w = jax.random.uniform(kw, (fan_in, fan_out), jnp.float32, -bound, bound)
        b = jax.random.uniform(kb, (1, fan_out), jnp.float32, -bound, bound)
        return w, b

    w1, b1 = lin(ks[0], d_in, h1)
    w2, b2 = lin(ks[1], h1, h2)
    wh, bh = lin(ks[2], h2, out_dim)
    emb = jax.random.normal(ks[3], (int(sum(categories)), d_embedding),
                            jnp.float32)
    offsets = jnp.asarray(np.concatenate([[0], np.cumsum(categories)[:-1]]),
                          dtype=jnp.int32)
    return {"w1": w1, "b1": b1, "w2": w2, "b2": b2, "wh": wh, "bh": bh,
            "cat_embedding": emb, "cat_offsets": offsets}


def prepare_kernel_params(params, n_num, categories, d_embedding):
    w1, b1 = params["w1"], params["b1"]
    w2, b2 = params["w2"], params["b2"]
    wh, bh = params["wh"], params["bh"]
    emb = params["cat_embedding"]

    d_in, h1 = w1.shape
    h2 = w2.shape[1]
    out_dim = wh.shape[1]
    total_cat = emb.shape[0]

    H1 = _round_up(h1, 128)
    H2 = _round_up(h2, 128)
    OUTP = _round_up(out_dim, 128)
    TC = _round_up(total_cat, 8)

    # Fold the embedding table into layer 1:
    #   T[g, :] = emb[g, :] @ w1e[j(g)*d_emb : (j(g)+1)*d_emb, :]
    w1e = w1[n_num:, :]
    offsets = np.concatenate([[0], np.cumsum(categories)[:-1]]).astype(np.int64)
    parts = []
    for j, c in enumerate(categories):
        rows = emb[int(offsets[j]):int(offsets[j]) + int(c), :]
        parts.append(rows @ w1e[j * d_embedding:(j + 1) * d_embedding, :])
    t = jnp.concatenate(parts, axis=0)                      # (total_cat, h1) f32

    return {
        "w1n": _pad2d(w1[:n_num, :], n_num, H1).astype(jnp.bfloat16),
        "t": _pad2d(t, TC, H1).astype(jnp.bfloat16),
        "b1": _pad2d(b1, 1, H1).astype(jnp.float32),
        "w2": _pad2d(w2, H1, H2).astype(jnp.bfloat16),
        "b2": _pad2d(b2, 1, H2).astype(jnp.float32),
        "wh": _pad2d(wh, H2, OUTP).astype(jnp.bfloat16),
        "bh": _pad2d(bh, 1, OUTP).astype(jnp.float32),
        "offsets": params["cat_offsets"].astype(jnp.int32),
    }


def reference_forward(inputs_n, inputs_c, params):
    """Pure-JAX f32 reference (mirrors the PyTorch forward, eval mode)."""
    idx = inputs_c.astype(jnp.int32) + params["cat_offsets"][None, :]
    emb = jnp.take(params["cat_embedding"], idx, axis=0)
    emb = emb.reshape(inputs_n.shape[0], -1)
    x = jnp.concatenate([inputs_n, emb], axis=-1).astype(jnp.float32)
    h = jnp.maximum(x @ params["w1"] + params["b1"], 0.0)
    h = jnp.maximum(h @ params["w2"] + params["b2"], 0.0)
    return h @ params["wh"] + params["bh"]


if __name__ == "__main__":
    # Small, forward-consistent shapes (tabular model):
    n_num_features = 4
    categories = [3, 5]            # cardinalities of the 2 categorical cols
    d_embedding = 8
    d_layers = [32, 32]            # config['model']['d_layers']
    out_dim = 2

    key = jax.random.PRNGKey(0)
    k_n, k_c, k_p = jax.random.split(key, 3)

    params = init_params(k_p, n_num_features, categories, d_embedding,
                         d_layers, out_dim)
    kp = prepare_kernel_params(params, n_num_features, categories, d_embedding)

    for B in (8, 600):             # single-tile case and multi-tile/padded case
        kn = jax.random.fold_in(k_n, B)
        kc = jax.random.fold_in(k_c, B)
        inputs_n = jax.random.normal(kn, (B, n_num_features), jnp.float32)
        inputs_c = jnp.stack(
            [jax.random.randint(jax.random.fold_in(kc, i), (B,), 0, c)
             for i, c in enumerate(categories)], axis=1).astype(jnp.int32)

        out = model_forward(inputs_n, inputs_c, kp, out_dim)
        out = jax.block_until_ready(out)
        assert out.shape == (B, out_dim) and out.dtype == jnp.float32

        ref = reference_forward(inputs_n, inputs_c, params)
        max_err = float(jnp.max(jnp.abs(out - ref)))
        assert max_err < 3e-2, f"max abs err {max_err} too large (B={B})"

    print("KERNEL_OK")
</pallas_src>

<mosaic_0001>
module attributes {stable_mosaic.version = 11 : i64} {
  func.func @_fused_mlp_kernel(%arg0: i32, %arg1: memref<16x4xbf16, #tpu.memory_space<vmem>>, %arg2: memref<16x2xi32, #tpu.memory_space<vmem>>, %arg3: memref<4x128xbf16, #tpu.memory_space<vmem>>, %arg4: memref<8x128xbf16, #tpu.memory_space<vmem>>, %arg5: memref<1x128xf32, #tpu.memory_space<vmem>>, %arg6: memref<128x128xbf16, #tpu.memory_space<vmem>>, %arg7: memref<1x128xf32, #tpu.memory_space<vmem>>, %arg8: memref<128x128xbf16, #tpu.memory_space<vmem>>, %arg9: memref<1x128xf32, #tpu.memory_space<vmem>>, %arg10: memref<16x2xf32, #tpu.memory_space<vmem>>) attributes {dimension_semantics = [#tpu.dimension_semantics<parallel>], iteration_bounds = array<i64: 1>, scalar_prefetch = 0 : i64, scratch_operands = 0 : i64, tpu.core_type = #tpu.core_type<tc>, window_params = [{transform_indices = @transform_0, window_bounds = array<i64: 16, 4>}, {transform_indices = @transform_1, window_bounds = array<i64: 16, 2>}, {pipeline_mode = #tpu.pipeline_mode<synchronous>, transform_indices = @transform_2, window_bounds = array<i64: 4, 128>}, {pipeline_mode = #tpu.pipeline_mode<synchronous>, transform_indices = @transform_3, window_bounds = array<i64: 8, 128>}, {pipeline_mode = #tpu.pipeline_mode<synchronous>, transform_indices = @transform_4, window_bounds = array<i64: 1, 128>}, {pipeline_mode = #tpu.pipeline_mode<synchronous>, transform_indices = @transform_5, window_bounds = array<i64: 128, 128>}, {pipeline_mode = #tpu.pipeline_mode<synchronous>, transform_indices = @transform_6, window_bounds = array<i64: 1, 128>}, {pipeline_mode = #tpu.pipeline_mode<synchronous>, transform_indices = @transform_7, window_bounds = array<i64: 128, 128>}, {pipeline_mode = #tpu.pipeline_mode<synchronous>, transform_indices = @transform_8, window_bounds = array<i64: 1, 128>}, {transform_indices = @transform_9, window_bounds = array<i64: 16, 2>}]} {
    %c0 = arith.constant 0 : index
    %c0_0 = arith.constant 0 : index
    %0 = vector.load %arg1[%c0, %c0_0] : memref<16x4xbf16, #tpu.memory_space<vmem>>, vector<16x4xbf16>
    %c0_1 = arith.constant 0 : index
    %c0_2 = arith.constant 0 : index
    %1 = vector.load %arg3[%c0_1, %c0_2] : memref<4x128xbf16, #tpu.memory_space<vmem>>, vector<4x128xbf16>
    %cst = arith.constant dense<0.000000e+00> : vector<16x128xf32>
    %2 = tpu.matmul %0, %1, %cst {dimension_numbers = #tpu.dot_dimension_numbers<[1], [0], [0], [1], [0, 0, 1, 1], [], []>} : vector<16x4xbf16>, vector<4x128xbf16>, vector<16x128xf32> -> vector<16x128xf32>
    %c0_3 = arith.constant 0 : index
    %c0_4 = arith.constant 0 : index
    %3 = vector.load %arg2[%c0_3, %c0_4] : memref<16x2xi32, #tpu.memory_space<vmem>>, vector<16x2xi32>
    %4 = tpu.iota {dimensions = array<i32: 1>} : vector<16x8xi32>
    %5 = vector.extract_strided_slice %3 {offsets = [0, 0], sizes = [16, 1], strides = [1, 1]} : vector<16x2xi32> to vector<16x1xi32>
    %6 = vector.broadcast %5 : vector<16x1xi32> to vector<16x8xi32>
    %7 = arith.cmpi eq, %6, %4 : vector<16x8xi32>
    %8 = arith.extui %7 : vector<16x8xi1> to vector<16x8xi32>
    %9 = arith.sitofp %8 : vector<16x8xi32> to vector<16x8xf32>
    %10 = arith.truncf %9 : vector<16x8xf32> to vector<16x8xbf16>
    %11 = vector.extract_strided_slice %3 {offsets = [0, 1], sizes = [16, 1], strides = [1, 1]} : vector<16x2xi32> to vector<16x1xi32>
    %12 = vector.broadcast %11 : vector<16x1xi32> to vector<16x8xi32>
    %13 = arith.cmpi eq, %12, %4 : vector<16x8xi32>
    %14 = arith.extui %13 : vector<16x8xi1> to vector<16x8xi32>
    %15 = arith.sitofp %14 : vector<16x8xi32> to vector<16x8xf32>
    %16 = arith.truncf %15 : vector<16x8xf32> to vector<16x8xbf16>
    %17 = arith.addf %10, %16 : vector<16x8xbf16>
    %c0_5 = arith.constant 0 : index
    %c0_6 = arith.constant 0 : index
    %18 = vector.load %arg4[%c0_5, %c0_6] : memref<8x128xbf16, #tpu.memory_space<vmem>>, vector<8x128xbf16>
    %cst_7 = arith.constant dense<0.000000e+00> : vector<16x128xf32>
    %19 = tpu.matmul %17, %18, %cst_7 {dimension_numbers = #tpu.dot_dimension_numbers<[1], [0], [0], [1], [0, 0, 1, 1], [], []>} : vector<16x8xbf16>, vector<8x128xbf16>, vector<16x128xf32> -> vector<16x128xf32>
    %20 = arith.addf %2, %19 : vector<16x128xf32>
    %c0_8 = arith.constant 0 : index
    %c0_9 = arith.constant 0 : index
    %21 = vector.load %arg5[%c0_8, %c0_9] : memref<1x128xf32, #tpu.memory_space<vmem>>, vector<1x128xf32>
    %22 = vector.broadcast %21 : vector<1x128xf32> to vector<16x128xf32>
    %23 = arith.addf %20, %22 : vector<16x128xf32>
    %cst_10 = arith.constant 0.000000e+00 : f32
    %24 = vector.broadcast %cst_10 : f32 to vector<16x128xf32>
    %25 = arith.maximumf %23, %24 : vector<16x128xf32>
    %26 = arith.truncf %25 : vector<16x128xf32> to vector<16x128xbf16>
    %c0_11 = arith.constant 0 : index
    %c0_12 = arith.constant 0 : index
    %27 = vector.load %arg6[%c0_11, %c0_12] : memref<128x128xbf16, #tpu.memory_space<vmem>>, vector<128x128xbf16>
    %cst_13 = arith.constant dense<0.000000e+00> : vector<16x128xf32>
    %28 = tpu.matmul %26, %27, %cst_13 {dimension_numbers = #tpu.dot_dimension_numbers<[1], [0], [0], [1], [0, 0, 1, 1], [], []>} : vector<16x128xbf16>, vector<128x128xbf16>, vector<16x128xf32> -> vector<16x128xf32>
    %c0_14 = arith.constant 0 : index
    %c0_15 = arith.constant 0 : index
    %29 = vector.load %arg7[%c0_14, %c0_15] : memref<1x128xf32, #tpu.memory_space<vmem>>, vector<1x128xf32>
    %30 = vector.broadcast %29 : vector<1x128xf32> to vector<16x128xf32>
    %31 = arith.addf %28, %30 : vector<16x128xf32>
    %cst_16 = arith.constant 0.000000e+00 : f32
    %32 = vector.broadcast %cst_16 : f32 to vector<16x128xf32>
    %33 = arith.maximumf %31, %32 : vector<16x128xf32>
    %34 = arith.truncf %33 : vector<16x128xf32> to vector<16x128xbf16>
    %c0_17 = arith.constant 0 : index
    %c0_18 = arith.constant 0 : index
    %35 = vector.load %arg8[%c0_17, %c0_18] : memref<128x128xbf16, #tpu.memory_space<vmem>>, vector<128x128xbf16>
    %cst_19 = arith.constant dense<0.000000e+00> : vector<16x128xf32>
    %36 = tpu.matmul %34, %35, %cst_19 {dimension_numbers = #tpu.dot_dimension_numbers<[1], [0], [0], [1], [0, 0, 1, 1], [], []>} : vector<16x128xbf16>, vector<128x128xbf16>, vector<16x128xf32> -> vector<16x128xf32>
    %c0_20 = arith.constant 0 : index
    %c0_21 = arith.constant 0 : index
    %37 = vector.load %arg9[%c0_20, %c0_21] : memref<1x128xf32, #tpu.memory_space<vmem>>, vector<1x128xf32>
    %38 = vector.broadcast %37 : vector<1x128xf32> to vector<16x128xf32>
    %39 = arith.addf %36, %38 : vector<16x128xf32>
    %40 = vector.extract_strided_slice %39 {offsets = [0, 0], sizes = [16, 2], strides = [1, 1]} : vector<16x128xf32> to vector<16x2xf32>
    %c0_22 = arith.constant 0 : index
    %c0_23 = arith.constant 0 : index
    %41 = vector.load %arg10[%c0_22, %c0_23] : memref<16x2xf32, #tpu.memory_space<vmem>>, vector<16x2xf32>
    tpu.vector_store %arg10[%c0_22, %c0_23], %40 {strides = array<i32>} : memref<16x2xf32, #tpu.memory_space<vmem>>, vector<16x2xf32>,
    return
  }
  func.func @transform_0(%arg0: i32) -> (i32, i32) {
    %c0_i32 = arith.constant 0 : i32
    %c0_i32_0 = arith.constant 0 : i32
    return %arg0, %c0_i32 : i32, i32
  }
  func.func @transform_1(%arg0: i32) -> (i32, i32) {
    %c0_i32 = arith.constant 0 : i32
    %c0_i32_0 = arith.constant 0 : i32
    return %arg0, %c0_i32 : i32, i32
  }
  func.func @transform_2(%arg0: i32) -> (i32, i32) {
    %c0_i32 = arith.constant 0 : i32
    %c0_i32_0 = arith.constant 0 : i32
    %c0_i32_1 = arith.constant 0 : i32
    return %c0_i32, %c0_i32_0 : i32, i32
  }
  func.func @transform_3(%arg0: i32) -> (i32, i32) {
    %c0_i32 = arith.constant 0 : i32
    %c0_i32_0 = arith.constant 0 : i32
    %c0_i32_1 = arith.constant 0 : i32
    return %c0_i32, %c0_i32_0 : i32, i32
  }
  func.func @transform_4(%arg0: i32) -> (i32, i32) {
    %c0_i32 = arith.constant 0 : i32
    %c0_i32_0 = arith.constant 0 : i32
    %c0_i32_1 = arith.constant 0 : i32
    return %c0_i32, %c0_i32_0 : i32, i32
  }
  func.func @transform_5(%arg0: i32) -> (i32, i32) {
    %c0_i32 = arith.constant 0 : i32
    %c0_i32_0 = arith.constant 0 : i32
    %c0_i32_1 = arith.constant 0 : i32
    return %c0_i32, %c0_i32_0 : i32, i32
  }
  func.func @transform_6(%arg0: i32) -> (i32, i32) {
    %c0_i32 = arith.constant 0 : i32
    %c0_i32_0 = arith.constant 0 : i32
    %c0_i32_1 = arith.constant 0 : i32
    return %c0_i32, %c0_i32_0 : i32, i32
  }
  func.func @transform_7(%arg0: i32) -> (i32, i32) {
    %c0_i32 = arith.constant 0 : i32
    %c0_i32_0 = arith.constant 0 : i32
    %c0_i32_1 = arith.constant 0 : i32
    return %c0_i32, %c0_i32_0 : i32, i32
  }
  func.func @transform_8(%arg0: i32) -> (i32, i32) {
    %c0_i32 = arith.constant 0 : i32
    %c0_i32_0 = arith.constant 0 : i32
    %c0_i32_1 = arith.constant 0 : i32
    return %c0_i32, %c0_i32_0 : i32, i32
  }
  func.func @transform_9(%arg0: i32) -> (i32, i32) {
    %c0_i32 = arith.constant 0 : i32
    %c0_i32_0 = arith.constant 0 : i32
    return %arg0, %c0_i32 : i32, i32
  }
}

</mosaic_0001>

<bundles_post_ra>
// kernel: tpu_custom_call.1
= control target key start
LH: loop header
LB: loop body
LE: loop exit
PB: predicated region body
PF: predicated region fallthrough
CT: control target
= control target key end

     0   :  { %14 = vsyncpa [#allocation3], 0  ;;  %s591_s0 = inlined_call_operand.vmem [shape: bf16[16,4], index: 0, kind: input, shape index: {}]   ;;  %s592_s1 = inlined_call_operand.vmem [shape: s32[16,2], index: 1, kind: input, shape index: {}]   ;;  %s593_s2 = inlined_call_operand.vmem [shape: bf16[4,128], index: 2, kind: input, shape index: {}]   ;;  %s594_s3 = inlined_call_operand.vmem [shape: bf16[8,128], index: 3, kind: input, shape index: {}]   ;;  %s595_s4 = inlined_call_operand.vmem [shape: f32[1,128], index: 4, kind: input, shape index: {}]   ;;  %s596_s5 = inlined_call_operand.hbm [shape: bf16[128,128], index: 5, kind: input, shape index: {}]   ;;  %s597_s6 = inlined_call_operand.vmem [shape: f32[1,128], index: 6, kind: input, shape index: {}]   ;;  %s598_s7 = inlined_call_operand.hbm [shape: bf16[128,128], index: 7, kind: input, shape index: {}]   ;;  %s599_s8 = inlined_call_operand.vmem [shape: f32[1,128], index: 8, kind: input, shape index: {}]   ;;  %s600_s9 = inlined_call_operand.vmem [shape: f32[16,2], index: 9, kind: output, shape index: {}]  }
   0x1   :  { %s30_s11 = sshll.u32 %s596_s5, 4  ;;  %s31_s11 = int_to_ptr.hbm [resolvable:$true] %s30_s11 }
   0x2   :  { %15 = vsyncpa [#allocation5], 0  ;;  %s498_s12 = smov [#allocation2]   ;;  %s45_s16 = sshll.u32 %s598_s7, 4  ;;  %s46_s16 = int_to_ptr.hbm [resolvable:$true] %s45_s16 }
   0x3   :  { %s32_s13 = sshll.u32 %s498_s12, 4  ;;  %s499_s17 = smov 64   ;;  %s33_s13 = int_to_ptr.vmem [resolvable:$true] %s32_s13 }
   0x4   :  { %s500_s18 = smov 4   ;;  %s501_s19 = smov [#allocation4]  }
   0x5   :  { %38 = dma.hbm_to_vmem [thread:$0]  %s31_s11, 1024, %s33_s13, [#allocation3], %s499_s17, %s499_s17, %s500_s18  }
   0x6   :  { %s47_s20 = sshll.u32 %s501_s19, 4  ;;  %s48_s20 = int_to_ptr.vmem [resolvable:$true] %s47_s20 }
   0x7   :  { %53 = dma.hbm_to_vmem [thread:$0]  %s46_s16, 1024, %s48_s20, [#allocation5], %s499_s17, %s499_s17, %s500_s18  }
   0x8   :  { %494 = dma.done.wait [#allocation3], 1024  }
   0x9   :  { %495 = vsyncadd [#allocation3], 4294966272 }
   0xa   :  { %496 = dma.done.wait [#allocation5], 1024  }
   0xb   :  { %497 = vsyncadd [#allocation5], 4294966272  ;;  %v502_v0 = vmov 1   ;;  %v503_v1 = vmov 0   ;;  %v68_v2 = vld [vmem:[%s592_s1] sm:$0xff]  ;;  %v69_v3 = vld [vmem:[%s592_s1 + $0x8] sm:$0xff]  ;;  %v70_v11 = vlaneseq }
   0xc   :  { %441 = vset.pattern.permute.xlu1 %v502_v0  ;;  %440 = vset.pattern.permute.xlu0 %v503_v1  ;;  %v67_v4 = vld [vmem:[%s593_s2] sm:$0x3]  ;;  %vm139_vm0 = vcmask 1041408   ;;  %vm135_vm1 = vcmask 31744   ;;  %vm112_vm2 = vcmask 1043456   ;;  %v424_v9 = vld [vmem:[#allocation2 + $0x38] sm:$0xff] }
   0xd   :  { %87 = vperm.xlu1 %441, %v68_v2   ;;  %73 = vperm.xlu0 %440, %v68_v2   ;;  %v141_v5 = vsel %vm139_vm0, %v67_v4, 0  ;;  %v416_v6 = vld [vmem:[%s591_s0] sm:$0xff]  ;;  %v423_v10 = vld [vmem:[#allocation2 + $0x30] sm:$0xff]  ;;  %v71_v14 = vand.u32 127, %v70_v11  ;;  %v504_v15 = vmov 0.0   ;;  %vm108_vm7 = vcmask 64512  }
   0xe   :  { %150 = vmatpush.bf16.msra.mxu1 %v141_v5  ;;  %v107_v7 = vld [vmem:[%s594_s3] sm:$0xf]  ;;  %234 = vmatpush.bf16.msra.mxu2 %v424_v9  ;;  %v422_v25 = vld [vmem:[#allocation2 + $0x28] sm:$0xff]  ;;  %v420_v27 = vld [vmem:[#allocation2 + $0x18] sm:$0xff]  ;;  %vm333_vm8 = vcmask 15360  }
   0xf   :  { %v114_v8 = vsel %vm112_vm2, %v107_v7, 0  ;;  %v421_v26 = vld [vmem:[#allocation2 + $0x20] sm:$0xff]  ;;  %v419_v28 = vld [vmem:[#allocation2 + $0x10] sm:$0xff]  ;;  %v418_v29 = vld [vmem:[#allocation2 + $0x8] sm:$0xff] }
  0x10   :  { %123 = vmatpush.bf16.msra.mxu0 %v114_v8  ;;  %v417_v30 = vld [vmem:[#allocation2] sm:$0xff]  ;;  %v432_v31 = vld [vmem:[#allocation4 + $0x38] sm:$0xff]  ;;  %v431_v32 = vld [vmem:[#allocation4 + $0x30] sm:$0xff] }
  0x11   :  { %351 = vmatmul.msk.bf16.vlgmr.msra.gmra.mxu1 %vm135_vm1, %v416_v6  ;;  %319 = vmatpush.bf16.msra.mxu3 %v432_v31  ;;  %v430_v33 = vld [vmem:[#allocation4 + $0x28] sm:$0xff]  ;;  %v429_v34 = vld [vmem:[#allocation4 + $0x20] sm:$0xff]  ;;  %v428_v47 = vld [vmem:[#allocation4 + $0x18] sm:$0xff] }
  0x12   :  { %235 = vmatpush.bf16.msra.mxu2 %v423_v10  ;;  %v443_v38 = vld [vmem:[%s595_s4] ss:$0 sm:$0xff]  ;;  %v427_v48 = vld [vmem:[#allocation4 + $0x10] sm:$0xff]  ;;  %v426_v49 = vld [vmem:[#allocation4 + $0x8] sm:$0xff] }
  0x13   :  { %v425_v50 = vld [vmem:[#allocation4] sm:$0xff] }
  0x14   :  { %v444_v52 = vld [vmem:[%s597_s6] ss:$0 sm:$0xff] }
  0x15   :  { %90 = vperm.xlu1 %441, %v69_v3   ;;  %76 = vperm.xlu0 %440, %v69_v3   ;;  %v445_v59 = vld [vmem:[%s599_s8] ss:$0 sm:$0xff] }
  0x16   :  { %236 = vmatpush.bf16.msra.mxu2 %v422_v25  ;;  %320 = vmatpush.bf16.msra.mxu3 %v431_v32 }
  0x1a   :  { %237 = vmatpush.bf16.msra.mxu2 %v421_v26  ;;  %321 = vmatpush.bf16.msra.mxu3 %v430_v33 }
  0x1d   :  { %442 = vset.pattern.permute.xlu0 %v502_v0 }
  0x1e   :  { %238 = vmatpush.bf16.msra.mxu2 %v420_v27  ;;  %322 = vmatpush.bf16.msra.mxu3 %v429_v34 }
  0x22   :  { %239 = vmatpush.bf16.msra.mxu2 %v419_v28  ;;  %323 = vmatpush.bf16.msra.mxu3 %v428_v47 }
  0x26   :  { %240 = vmatpush.bf16.msra.mxu2 %v418_v29  ;;  %324 = vmatpush.bf16.msra.mxu3 %v427_v48 }
  0x2a   :  { %241 = vmatpush.bf16.msra.mxu2 %v417_v30  ;;  %325 = vmatpush.bf16.msra.mxu3 %v426_v49 }
  0x2e   :  { %326 = vmatpush.bf16.msra.mxu3 %v425_v50 }
  0x7f   :  { %v88_v12 = vpop.permute.xlu1 %87  ;;  %v74_v13 = vpop.permute.xlu0 %73 }
  0x80   :  { %vm92_vm3 = vcmp.eq.s32.totalorder %v88_v12, %v71_v14  ;;  %vm78_vm4 = vcmp.eq.s32.totalorder %v74_v13, %v71_v14 }
  0x81   :  { %v344_v16 = vsel %vm92_vm3, 1.0, %v504_v15  ;;  %v342_v17 = vsel %vm78_vm4, 1.0, %v504_v15 }
  0x82   :  { %v104_v22 = vadd.f32 %v344_v16, %v342_v17 }
  0x87   :  { %v91_v18 = vpop.permute.xlu1 %90  ;;  %v77_v19 = vpop.permute.xlu0 %76 }
  0x88   :  { %vm93_vm5 = vcmp.eq.s32.totalorder %v91_v18, %v71_v14  ;;  %vm79_vm6 = vcmp.eq.s32.totalorder %v77_v19, %v71_v14 }
  0x89   :  { %v345_v20 = vsel %vm93_vm5, 1.0, %v504_v15  ;;  %v343_v21 = vsel %vm79_vm6, 1.0, %v504_v15 }
  0x8a   :  { %v105_v23 = vadd.f32 %v345_v20, %v343_v21 }
  0x8c   :  { %v106_v24 = vpack.c.bf16 %v105_v23, %v104_v22 }
  0x8e   :  { %346 = vmatmul.msk.bf16.vlgmr.msra.gmra.mxu0 %vm108_vm7, %v106_v24  ;;  %v152_v35 = vpop.f32.mrf.mxu1 }
  0x96   :  { %v154_v39 = vpop.f32.mrf.mxu1 }
 0x10b   :  { %v125_v36 = vpop.f32.mrf.mxu0 }
 0x10c   :  { %v153_v37 = vadd.f32 %v152_v35, %v125_v36 }
 0x10e   :  { %v161_v41 = vadd.f32 %v443_v38, %v153_v37 }
 0x110   :  { %v163_v44 = vmax.f32 %v161_v41, 0.0 }
 0x113   :  { %v127_v40 = vpop.f32.mrf.mxu0 }
 0x114   :  { %v155_v42 = vadd.f32 %v154_v39, %v127_v40 }
 0x116   :  { %v162_v43 = vadd.f32 %v443_v38, %v155_v42 }
 0x118   :  { %v164_v45 = vmax.f32 %v162_v43, 0.0 }
 0x11a   :  { %v165_v46 = vpack.c.bf16 %v164_v45, %v163_v44 }
 0x11c   :  { %242 = vmatmul.bf16.vlgmr.msra.gmra.mxu2 %v165_v46 }
 0x19f   :  { %v243_v51 = vpop.f32.mrf.mxu2 }
 0x1a0   :  { %v244_v53 = vadd.f32 %v444_v52, %v243_v51 }
 0x1a2   :  { %v248_v56 = vmax.f32 %v244_v53, 0.0 }
 0x1a7   :  { %v245_v54 = vpop.f32.mrf.mxu2 }
 0x1a8   :  { %v246_v55 = vadd.f32 %v444_v52, %v245_v54 }
 0x1aa   :  { %v249_v57 = vmax.f32 %v246_v55, 0.0 }
 0x1ac   :  { %v250_v58 = vpack.c.bf16 %v249_v57, %v248_v56 }
 0x1ae   :  { %327 = vmatmul.bf16.vlgmr.msra.gmra.mxu3 %v250_v58 }
 0x231   :  { %v328_v60 = vpop.f32.mrf.mxu3 }
 0x232   :  { %v329_v61 = vadd.f32 %v445_v59, %v328_v60 }
 0x234   :  { %334 = vst.msk [vmem:[%s600_s9] sm:$0xff] %vm333_vm8, %v329_v61 }
 0x239   :  { %v330_v62 = vpop.f32.mrf.mxu3 }
 0x23a   :  { %v331_v63 = vadd.f32 %v445_v59, %v330_v62 }
 0x23c   :  { %335 = vst.msk [vmem:[%s600_s9 + $0x8] sm:$0xff] %vm333_vm8, %v331_v63 }
 0x23d   :  { %340 = vsyncpa [#allocation3], 1 }
 0x23e   :  { %341 = vsyncpa [#allocation5], 1 }

</bundles_post_ra>
